<compile_context>
chip_gen: v6e
topology: v6e:2x2x1
jax: 0.10.0
libtpu: 0.0.40
codegen_flags: <defaults>
</compile_context>

<pallas_src>
import functools

import jax
import jax.numpy as jnp
from jax.experimental import pallas as pl
from jax.experimental.pallas import tpu as pltpu

H1, H2, H3 = 512, 256, 128      # MLP widths (match the PyTorch module)
HEAD = 128                      # fused (action|value) head, lane-padded
X_PAD = 128                     # [state|beliefs] padded to one 128-lane block


# ----------------------------------------------------------------------------
# Fused Pallas kernel
# ----------------------------------------------------------------------------
def _actor_critic_kernel(num_actions, xg_ref, w1_ref, w2_ref, w3_ref, wh_ref,
                         bias_ref, out_ref):
    # xg_ref   : (1, 256) f32  lanes [0:in_dim) = [state | beliefs],
    #                          lanes [128:256)  = Gumbel(0,1) noise
    # w1..w3   : bf16 weights (in, out);  wh : (128, 128) bf16 fused head
    # bias_ref : (1, 1024) f32 = [b1(512) | b2(256) | b3(128) | bh(128)]
    # out_ref  : (1, 128)  f32 output slab
    in_dim = w1_ref.shape[0]

    x = xg_ref[:, 0:in_dim].astype(jnp.bfloat16)          # (1, S+G*L)
    gum = xg_ref[:, X_PAD:X_PAD + HEAD]                    # (1, 128)

    # ---- 3-layer MLP (bf16 weights, f32 accumulation) + extra ReLU ----------
    h = jnp.dot(x, w1_ref[...], preferred_element_type=jnp.float32)
    h = jnp.maximum(h + bias_ref[:, 0:512], 0.0)
    h = jnp.dot(h.astype(jnp.bfloat16), w2_ref[...],
                preferred_element_type=jnp.float32)
    h = jnp.maximum(h + bias_ref[:, 512:768], 0.0)
    h = jnp.dot(h.astype(jnp.bfloat16), w3_ref[...],
                preferred_element_type=jnp.float32)
    h = jnp.maximum(h + bias_ref[:, 768:896], 0.0)         # F.relu in forward()

    # ---- fused (action | value) head, zero-padded to 128 lanes --------------
    head = jnp.dot(h.astype(jnp.bfloat16), wh_ref[...],
                   preferred_element_type=jnp.float32) + bias_ref[:, 896:1024]

    lane = jax.lax.broadcasted_iota(jnp.int32, head.shape, 1)
    valid = lane < num_actions
    neg = jnp.float32(-1e30)

    # ---- exact masked log-softmax over the action lanes ----------------------
    masked = jnp.where(valid, head, neg)
    m = jnp.max(masked, axis=-1, keepdims=True)
    e = jnp.exp(masked - m)                                # invalid lanes -> 0
    lse = m + jnp.log(jnp.sum(e, axis=-1, keepdims=True))
    logp = head - lse

    # ---- categorical sample via Gumbel-max ------------------------------------
    z = jnp.where(valid, logp + gum, neg)
    zmax = jnp.max(z, axis=-1, keepdims=True)
    action = jnp.min(jnp.where(z >= zmax, lane, head.shape[-1]),
                     axis=-1, keepdims=True)               # (1, 1) int32
    chosen = jnp.sum(jnp.where(lane == action, logp, 0.0),
                     axis=-1, keepdims=True)               # log-prob of action

    # ---- single lane-dense output slab ----------------------------------------
    out = jnp.where(valid, logp, 0.0)                              # lanes 0..A-1
    out = out + jnp.where(lane == num_actions, head, 0.0)          # value
    out = out + jnp.where(lane == num_actions + 1, chosen, 0.0)    # log-prob
    out = out + jnp.where(lane == num_actions + 2,
                          action.astype(jnp.float32), 0.0)         # action id
    out_ref[...] = out


def _vmem_spec():
    return pl.BlockSpec(memory_space=pltpu.MemorySpace.VMEM)


# ----------------------------------------------------------------------------
# Jitted wrapper: belief softmax + input/noise packing + pallas_call + unpack
# ----------------------------------------------------------------------------
@functools.partial(jax.jit, static_argnums=(0,))
def actor_critic_forward(num_actions, key, state, ghost, packed):
    """num_actions: static int; key: PRNG key; state (S,); ghost (G,L) logits."""
    w1, w2, w3, wh, bias = packed
    in_dim = w1.shape[0]

    # Belief softmax + concat (32 elements) — XLA-fused into input prep; keeps
    # layer-1 a single 2-D matmul without an in-kernel (G,L)->(1,G*L) relayout.
    belief = jax.nn.softmax(ghost.astype(jnp.float32), axis=-1)
    x = jnp.concatenate(
        [state.astype(jnp.float32).reshape(1, -1), belief.reshape(1, -1)],
        axis=-1)
    gumbel = jax.random.gumbel(key, (1, HEAD), jnp.float32)
    xg = jnp.concatenate(
        [x, jnp.zeros((1, X_PAD - in_dim), jnp.float32), gumbel], axis=-1)

    # TODO(synk): for repeated per-step inference, keep the packed bf16 weights
    # VMEM-resident across calls (cross-call prefetch / memory-space constraint)
    # instead of re-streaming ~190 KiB from HBM every invocation.
    slab = pl.pallas_call(
        functools.partial(_actor_critic_kernel, num_actions),
        out_shape=jax.ShapeDtypeStruct((1, HEAD), jnp.float32),
        in_specs=[_vmem_spec()] * 6,
        out_specs=_vmem_spec(),
    )(xg, w1, w2, w3, wh, bias)

    logp = slab[:, :num_actions]                        # (1, A)
    value = slab[:, num_actions:num_actions + 1]        # (1, 1)
    logprob = slab[0, num_actions + 1]                  # scalar
    action = slab[0, num_actions + 2].astype(jnp.int32)
    return action, logprob, value, logp


# ----------------------------------------------------------------------------
# Parameter init (PyTorch-Linear-style bounds) + kernel-layout packing
# ----------------------------------------------------------------------------
def init_linear(key, fan_in, fan_out):
    kw, kb = jax.random.split(key)
    bound = 1.0 / jnp.sqrt(jnp.float32(fan_in))
    w = jax.random.uniform(kw, (fan_in, fan_out), jnp.float32, -bound, bound)
    b = jax.random.uniform(kb, (1, fan_out), jnp.float32, -bound, bound)
    return w, b


def init_params(key, state_dim, ghost_dim, action_dim):
    ks = jax.random.split(key, 5)
    w1, b1 = init_linear(ks[0], state_dim + ghost_dim, H1)
    w2, b2 = init_linear(ks[1], H1, H2)
    w3, b3 = init_linear(ks[2], H2, H3)
    wa, ba = init_linear(ks[3], H3, action_dim)
    wv, bv = init_linear(ks[4], H3, 1)
    return (w1, b1, w2, b2, w3, b3, wa, ba, wv, bv)


def pack_params(params, action_dim):
    """f32 (in,out) params -> bf16 kernel layout (fused padded head, fused bias)."""
    w1, b1, w2, b2, w3, b3, wa, ba, wv, bv = params
    assert w1.shape[0] <= X_PAD and action_dim + 3 <= HEAD
    wh = jnp.zeros((H3, HEAD), jnp.float32)
    wh = wh.at[:, :action_dim].set(wa).at[:, action_dim].set(wv[:, 0])
    bh = jnp.zeros((1, HEAD), jnp.float32)
    bh = bh.at[:, :action_dim].set(ba).at[0, action_dim].set(bv[0, 0])
    bias = jnp.concatenate([b1, b2, b3, bh], axis=-1)             # (1, 1024)
    return (w1.astype(jnp.bfloat16), w2.astype(jnp.bfloat16),
            w3.astype(jnp.bfloat16), wh.astype(jnp.bfloat16),
            bias.astype(jnp.float32))


# ----------------------------------------------------------------------------
# Host-facing forward: mirrors BeliefAwareActorCriticAgent.forward
# ----------------------------------------------------------------------------
def forward(state, ghost_belief, packed, key, action_dim):
    state = jnp.asarray(state, jnp.float32).reshape(-1)
    ghost = jnp.stack([jnp.asarray(g, jnp.float32).reshape(-1)
                       for g in ghost_belief], axis=0)            # (G, L)
    return actor_critic_forward(action_dim, key, state, ghost, packed)


# Pure-JAX reference (same bf16-weight / f32-accumulate recipe as the kernel).
def reference_forward(params, state, ghost, action_dim):
    w1, b1, w2, b2, w3, b3, wa, ba, wv, bv = params
    bf = lambda t: t.astype(jnp.bfloat16)
    belief = jax.nn.softmax(ghost, axis=-1)
    x = jnp.concatenate([state.reshape(1, -1), belief.reshape(1, -1)], axis=-1)
    h = jnp.maximum(jnp.dot(bf(x), bf(w1), preferred_element_type=jnp.float32) + b1, 0.0)
    h = jnp.maximum(jnp.dot(bf(h), bf(w2), preferred_element_type=jnp.float32) + b2, 0.0)
    h = jnp.maximum(jnp.dot(bf(h), bf(w3), preferred_element_type=jnp.float32) + b3, 0.0)
    logits = jnp.dot(bf(h), bf(wa), preferred_element_type=jnp.float32) + ba
    value = jnp.dot(bf(h), bf(wv), preferred_element_type=jnp.float32) + bv
    logp = jax.nn.log_softmax(logits, axis=-1)
    return value, logp


# TODO(synk): episode buffers (logprobs/state_values/rewards), calculateLoss,
#             clearMemory, save/load and device placement are host/training
#             logic with no kernel equivalent; only forward() is implemented.

if __name__ == "__main__":
    STATE_DIM = 16
    N_GHOSTS = 4
    GHOST_LOGITS = 4            # per-ghost belief logits
    ACTION_DIM = 5

    key = jax.random.PRNGKey(0)
    k_params, k_state, k_ghost, k_sample = jax.random.split(key, 4)

    raw_params = init_params(k_params, STATE_DIM, N_GHOSTS * GHOST_LOGITS,
                             ACTION_DIM)
    packed = pack_params(raw_params, ACTION_DIM)

    state = jax.random.normal(k_state, (STATE_DIM,), jnp.float32)
    ghost_keys = jax.random.split(k_ghost, N_GHOSTS)
    ghost_belief = [jax.random.normal(gk, (GHOST_LOGITS,), jnp.float32)
                    for gk in ghost_keys]

    action, logprob, value, logp = forward(state, ghost_belief, packed,
                                           k_sample, ACTION_DIM)
    jax.block_until_ready((action, logprob, value, logp))

    # ------------------------- correctness checks ---------------------------
    a = int(action)
    assert 0 <= a < ACTION_DIM
    assert value.shape == (1, 1)
    assert bool(jnp.isfinite(logprob))
    assert abs(float(jnp.exp(logp).sum()) - 1.0) < 1e-3
    assert abs(float(logprob) - float(logp[0, a])) < 1e-5

    # Sample self-consistency: action is the Gumbel-max of the kernel's logp.
    gumbel = jax.random.gumbel(k_sample, (1, HEAD), jnp.float32)
    assert int(jnp.argmax(logp + gumbel[:, :ACTION_DIM])) == a

    # Parity with a pure-JAX reference using the same bf16 weight recipe.
    ghost = jnp.stack(ghost_belief, axis=0)
    ref_value, ref_logp = reference_forward(raw_params, state, ghost, ACTION_DIM)
    assert abs(float(ref_value[0, 0]) - float(value[0, 0])) < 5e-2
    assert float(jnp.max(jnp.abs(ref_logp - logp))) < 5e-2

    print("KERNEL_OK")
</pallas_src>

<mosaic_0001>
module attributes {stable_mosaic.version = 11 : i64} {
  func.func @_actor_critic_kernel(%arg0: memref<1x256xf32, #tpu.memory_space<vmem>>, %arg1: memref<32x512xbf16, #tpu.memory_space<vmem>>, %arg2: memref<512x256xbf16, #tpu.memory_space<vmem>>, %arg3: memref<256x128xbf16, #tpu.memory_space<vmem>>, %arg4: memref<128x128xbf16, #tpu.memory_space<vmem>>, %arg5: memref<1x1024xf32, #tpu.memory_space<vmem>>, %arg6: memref<1x128xf32, #tpu.memory_space<vmem>>) attributes {dimension_semantics = [], scalar_prefetch = 0 : i64, scratch_operands = 0 : i64, tpu.core_type = #tpu.core_type<tc>} {
    %c0 = arith.constant 0 : index
    %c0_0 = arith.constant 0 : index
    %0 = vector.load %arg0[%c0, %c0_0] : memref<1x256xf32, #tpu.memory_space<vmem>>, vector<1x32xf32>
    %1 = arith.truncf %0 : vector<1x32xf32> to vector<1x32xbf16>
    %c0_1 = arith.constant 0 : index
    %c128 = arith.constant 128 : index
    %2 = vector.load %arg0[%c0_1, %c128] : memref<1x256xf32, #tpu.memory_space<vmem>>, vector<1x128xf32>
    %c0_2 = arith.constant 0 : index
    %c0_3 = arith.constant 0 : index
    %3 = vector.load %arg1[%c0_2, %c0_3] : memref<32x512xbf16, #tpu.memory_space<vmem>>, vector<32x512xbf16>
    %cst = arith.constant dense<0.000000e+00> : vector<1x512xf32>
    %4 = tpu.matmul %1, %3, %cst {dimension_numbers = #tpu.dot_dimension_numbers<[1], [0], [0], [1], [0, 0, 1, 1], [], []>} : vector<1x32xbf16>, vector<32x512xbf16>, vector<1x512xf32> -> vector<1x512xf32>
    %c0_4 = arith.constant 0 : index
    %c0_5 = arith.constant 0 : index
    %5 = vector.load %arg5[%c0_4, %c0_5] : memref<1x1024xf32, #tpu.memory_space<vmem>>, vector<1x512xf32>
    %6 = arith.addf %4, %5 : vector<1x512xf32>
    %cst_6 = arith.constant 0.000000e+00 : f32
    %7 = vector.broadcast %cst_6 : f32 to vector<1x512xf32>
    %8 = arith.maximumf %6, %7 : vector<1x512xf32>
    %9 = arith.truncf %8 : vector<1x512xf32> to vector<1x512xbf16>
    %c0_7 = arith.constant 0 : index
    %c0_8 = arith.constant 0 : index
    %10 = vector.load %arg2[%c0_7, %c0_8] : memref<512x256xbf16, #tpu.memory_space<vmem>>, vector<512x256xbf16>
    %cst_9 = arith.constant dense<0.000000e+00> : vector<1x256xf32>
    %11 = tpu.matmul %9, %10, %cst_9 {dimension_numbers = #tpu.dot_dimension_numbers<[1], [0], [0], [1], [0, 0, 1, 1], [], []>} : vector<1x512xbf16>, vector<512x256xbf16>, vector<1x256xf32> -> vector<1x256xf32>
    %c0_10 = arith.constant 0 : index
    %c512 = arith.constant 512 : index
    %12 = vector.load %arg5[%c0_10, %c512] : memref<1x1024xf32, #tpu.memory_space<vmem>>, vector<1x256xf32>
    %13 = arith.addf %11, %12 : vector<1x256xf32>
    %cst_11 = arith.constant 0.000000e+00 : f32
    %14 = vector.broadcast %cst_11 : f32 to vector<1x256xf32>
    %15 = arith.maximumf %13, %14 : vector<1x256xf32>
    %16 = arith.truncf %15 : vector<1x256xf32> to vector<1x256xbf16>
    %c0_12 = arith.constant 0 : index
    %c0_13 = arith.constant 0 : index
    %17 = vector.load %arg3[%c0_12, %c0_13] : memref<256x128xbf16, #tpu.memory_space<vmem>>, vector<256x128xbf16>
    %cst_14 = arith.constant dense<0.000000e+00> : vector<1x128xf32>
    %18 = tpu.matmul %16, %17, %cst_14 {dimension_numbers = #tpu.dot_dimension_numbers<[1], [0], [0], [1], [0, 0, 1, 1], [], []>} : vector<1x256xbf16>, vector<256x128xbf16>, vector<1x128xf32> -> vector<1x128xf32>
    %c0_15 = arith.constant 0 : index
    %c768 = arith.constant 768 : index
    %19 = vector.load %arg5[%c0_15, %c768] : memref<1x1024xf32, #tpu.memory_space<vmem>>, vector<1x128xf32>
    %20 = arith.addf %18, %19 : vector<1x128xf32>
    %cst_16 = arith.constant 0.000000e+00 : f32
    %21 = vector.broadcast %cst_16 : f32 to vector<1x128xf32>
    %22 = arith.maximumf %20, %21 : vector<1x128xf32>
    %23 = arith.truncf %22 : vector<1x128xf32> to vector<1x128xbf16>
    %c0_17 = arith.constant 0 : index
    %c0_18 = arith.constant 0 : index
    %24 = vector.load %arg4[%c0_17, %c0_18] : memref<128x128xbf16, #tpu.memory_space<vmem>>, vector<128x128xbf16>
    %cst_19 = arith.constant dense<0.000000e+00> : vector<1x128xf32>
    %25 = tpu.matmul %23, %24, %cst_19 {dimension_numbers = #tpu.dot_dimension_numbers<[1], [0], [0], [1], [0, 0, 1, 1], [], []>} : vector<1x128xbf16>, vector<128x128xbf16>, vector<1x128xf32> -> vector<1x128xf32>
    %c0_20 = arith.constant 0 : index
    %c896 = arith.constant 896 : index
    %26 = vector.load %arg5[%c0_20, %c896] : memref<1x1024xf32, #tpu.memory_space<vmem>>, vector<1x128xf32>
    %27 = arith.addf %25, %26 : vector<1x128xf32>
    %28 = tpu.iota {dimensions = array<i32: 1>} : vector<1x128xi32>
    %c5_i32 = arith.constant 5 : i32
    %29 = vector.broadcast %c5_i32 : i32 to vector<1x128xi32>
    %30 = arith.cmpi slt, %28, %29 : vector<1x128xi32>
    %cst_21 = arith.constant -1.000000e+30 : f32
    %31 = vector.broadcast %cst_21 : f32 to vector<1x128xf32>
    %32 = arith.select %30, %27, %31 : vector<1x128xi1>, vector<1x128xf32>
    %cst_22 = arith.constant dense<0xFF800000> : vector<1xf32>
    %33 = vector.multi_reduction <maximumf>, %32, %cst_22 [1] : vector<1x128xf32> to vector<1xf32>
    %34 = vector.shape_cast %33 : vector<1xf32> to vector<1x1xf32>
    %35 = vector.broadcast %34 : vector<1x1xf32> to vector<1x128xf32>
    %36 = arith.subf %32, %35 : vector<1x128xf32>
    %37 = math.exp %36 : vector<1x128xf32>
    %cst_23 = arith.constant dense<0.000000e+00> : vector<1xf32>
    %38 = vector.multi_reduction <add>, %37, %cst_23 [1] : vector<1x128xf32> to vector<1xf32>
    %39 = vector.shape_cast %38 : vector<1xf32> to vector<1x1xf32>
    %40 = math.log %39 : vector<1x1xf32>
    %41 = arith.addf %34, %40 : vector<1x1xf32>
    %42 = vector.broadcast %41 : vector<1x1xf32> to vector<1x128xf32>
    %43 = arith.subf %27, %42 : vector<1x128xf32>
    %44 = arith.addf %43, %2 : vector<1x128xf32>
    %cst_24 = arith.constant -1.000000e+30 : f32
    %45 = vector.broadcast %cst_24 : f32 to vector<1x128xf32>
    %46 = arith.select %30, %44, %45 : vector<1x128xi1>, vector<1x128xf32>
    %cst_25 = arith.constant dense<0xFF800000> : vector<1xf32>
    %47 = vector.multi_reduction <maximumf>, %46, %cst_25 [1] : vector<1x128xf32> to vector<1xf32>
    %48 = vector.shape_cast %47 : vector<1xf32> to vector<1x1xf32>
    %49 = vector.broadcast %48 : vector<1x1xf32> to vector<1x128xf32>
    %50 = arith.cmpf oge, %46, %49 : vector<1x128xf32>
    %c128_i32 = arith.constant 128 : i32
    %51 = vector.broadcast %c128_i32 : i32 to vector<1x128xi32>
    %52 = arith.select %50, %28, %51 : vector<1x128xi1>, vector<1x128xi32>
    %cst_26 = arith.constant dense<2147483647> : vector<1xi32>
    %53 = vector.multi_reduction <minsi>, %52, %cst_26 [1] : vector<1x128xi32> to vector<1xi32>
    %54 = vector.shape_cast %53 : vector<1xi32> to vector<1x1xi32>
    %55 = vector.broadcast %54 : vector<1x1xi32> to vector<1x128xi32>
    %56 = arith.cmpi eq, %28, %55 : vector<1x128xi32>
    %cst_27 = arith.constant 0.000000e+00 : f32
    %57 = vector.broadcast %cst_27 : f32 to vector<1x128xf32>
    %58 = arith.select %56, %43, %57 : vector<1x128xi1>, vector<1x128xf32>
    %cst_28 = arith.constant dense<0.000000e+00> : vector<1xf32>
    %59 = vector.multi_reduction <add>, %58, %cst_28 [1] : vector<1x128xf32> to vector<1xf32>
    %60 = vector.shape_cast %59 : vector<1xf32> to vector<1x1xf32>
    %cst_29 = arith.constant 0.000000e+00 : f32
    %61 = vector.broadcast %cst_29 : f32 to vector<1x128xf32>
    %62 = arith.select %30, %43, %61 : vector<1x128xi1>, vector<1x128xf32>
    %c5_i32_30 = arith.constant 5 : i32
    %63 = vector.broadcast %c5_i32_30 : i32 to vector<1x128xi32>
    %64 = arith.cmpi eq, %28, %63 : vector<1x128xi32>
    %cst_31 = arith.constant 0.000000e+00 : f32
    %65 = vector.broadcast %cst_31 : f32 to vector<1x128xf32>
    %66 = arith.select %64, %27, %65 : vector<1x128xi1>, vector<1x128xf32>
    %67 = arith.addf %62, %66 : vector<1x128xf32>
    %c6_i32 = arith.constant 6 : i32
    %68 = vector.broadcast %c6_i32 : i32 to vector<1x128xi32>
    %69 = arith.cmpi eq, %28, %68 : vector<1x128xi32>
    %cst_32 = arith.constant 0.000000e+00 : f32
    %70 = vector.shape_cast %60 : vector<1x1xf32> to vector<1x1xf32>
    %71 = vector.broadcast %70 : vector<1x1xf32> to vector<1x128xf32>
    %72 = vector.broadcast %cst_32 : f32 to vector<1x128xf32>
    %73 = arith.select %69, %71, %72 : vector<1x128xi1>, vector<1x128xf32>
    %74 = arith.addf %67, %73 : vector<1x128xf32>
    %c7_i32 = arith.constant 7 : i32
    %75 = vector.broadcast %c7_i32 : i32 to vector<1x128xi32>
    %76 = arith.cmpi eq, %28, %75 : vector<1x128xi32>
    %77 = arith.sitofp %54 : vector<1x1xi32> to vector<1x1xf32>
    %cst_33 = arith.constant 0.000000e+00 : f32
    %78 = vector.shape_cast %77 : vector<1x1xf32> to vector<1x1xf32>
    %79 = vector.broadcast %78 : vector<1x1xf32> to vector<1x128xf32>
    %80 = vector.broadcast %cst_33 : f32 to vector<1x128xf32>
    %81 = arith.select %76, %79, %80 : vector<1x128xi1>, vector<1x128xf32>
    %82 = arith.addf %74, %81 : vector<1x128xf32>
    %c0_34 = arith.constant 0 : index
    %c0_35 = arith.constant 0 : index
    %83 = vector.load %arg6[%c0_34, %c0_35] : memref<1x128xf32, #tpu.memory_space<vmem>>, vector<1x128xf32>
    tpu.vector_store %arg6[%c0_34, %c0_35], %82 {strides = array<i32>} : memref<1x128xf32, #tpu.memory_space<vmem>>, vector<1x128xf32>,
    return
  }
}

</mosaic_0001>

<bundles_post_ra>
// kernel: actor_critic_forward.1
= control target key start
LH: loop header
LB: loop body
LE: loop exit
PB: predicated region body
PF: predicated region fallthrough
CT: control target
= control target key end

     0   :  { %11 = vsyncpa [#allocation3], 0  ;;  %s1580_s0 = inlined_call_operand.vmem [shape: f32[1,256], index: 0, kind: input, shape index: {}]   ;;  %s1581_s1 = inlined_call_operand.vmem [shape: bf16[32,512], index: 1, kind: input, shape index: {}]   ;;  %s1582_s2 = inlined_call_operand.hbm [shape: bf16[512,256], index: 2, kind: input, shape index: {}]   ;;  %s1583_s3 = inlined_call_operand.hbm [shape: bf16[256,128], index: 3, kind: input, shape index: {}]   ;;  %s1584_s4 = inlined_call_operand.hbm [shape: bf16[128,128], index: 4, kind: input, shape index: {}]   ;;  %s1585_s5 = inlined_call_operand.hbm [shape: f32[1,1024], index: 5, kind: input, shape index: {}]   ;;  %s1586_s6 = inlined_call_operand.vmem [shape: f32[1,128], index: 6, kind: output, shape index: {}]  }
   0x1   :  { %12 = vsyncpa [#allocation5], 0 }
   0x2   :  { %13 = vsyncpa [#allocation8], 0  ;;  %s1448_s21 = smov [#allocation4]  }
   0x3   :  { %s35_s22 = sshll.u32 %s1448_s21, 4  ;;  %s36_s22 = int_to_ptr.vmem [resolvable:$true] %s35_s22 }
   0x4   :  { %s1370_s23 = scalar_lea.vmem %s36_s22, 2048  ;;  %p1375_p1 = scmp.lt.s32.totalorder %s36_s22, %s36_s22 }
   0x5   :  { %p1371_p0 = scmp.ne.s32.totalorder %s36_s22, %s1370_s23  ;;  %p1376_p2 = scmp.lt.s32.totalorder %s1370_s23, %s1370_s23 }
   0x7   :  { %p1377_p3 = por %p1376_p2, %p1375_p1 }
   0x9   :  { %p1378_p4 = pnand %p1377_p3, %p1371_p0 }
   0xb   :  { %1381 = shalt.err (!%p1378_p4)
}
   0xc   :  { %s1449_s24 = smov 64   ;;  %s1450_s25 = smov 4  }
   0xd   :  { %41 = dma.hbm_to_vmem [thread:$0]  %s1583_s3, 2048, %s36_s22, [#allocation5], %s1449_s24, %s1449_s24, %s1450_s25  }
   0xe   :  { %s1451_s28 = smov [#allocation2]  }
   0xf   :  { %s23_s29 = sshll.u32 %s1451_s28, 4  ;;  %s24_s29 = int_to_ptr.vmem [resolvable:$true] %s23_s29 }
  0x10   :  { %s1390_s30 = scalar_lea.vmem %s24_s29, 8192  ;;  %p1395_p6 = scmp.lt.s32.totalorder %s24_s29, %s24_s29 }
  0x11   :  { %p1391_p5 = scmp.ne.s32.totalorder %s24_s29, %s1390_s30  ;;  %p1396_p7 = scmp.lt.s32.totalorder %s1390_s30, %s1390_s30 }
  0x13   :  { %p1397_p8 = por %p1396_p7, %p1395_p6 }
  0x15   :  { %p1398_p9 = pnand %p1397_p8, %p1391_p5 }
  0x17   :  { %1401 = shalt.err (!%p1398_p9)
}
  0x18   :  { %s1452_s7 = smov 128   ;;  %s1453_s8 = smov 8  }
  0x19   :  { %29 = dma.hbm_to_vmem [thread:$0]  %s1582_s2, 8192, %s24_s29, [#allocation3], %s1452_s7, %s1452_s7, %s1453_s8  }
  0x1a   :  { %s1454_s11 = smov [#allocation6]   ;;  %s1455_s13 = smov [#allocation7]  }
  0x1b   :  { %s47_s12 = sshll.u32 %s1454_s11, 4  ;;  %s60_s3 = sshll.u32 %s1455_s13, 4  ;;  %s48_s12 = int_to_ptr.vmem [resolvable:$true] %s47_s12  ;;  %s61_s3 = int_to_ptr.vmem [resolvable:$true] %s60_s3 }
  0x1c   :  { %s1410_s14 = scalar_lea.vmem %s48_s12, 1024  ;;  %p1415_p11 = scmp.lt.s32.totalorder %s48_s12, %s48_s12 }
  0x1d   :  { %p1411_p10 = scmp.ne.s32.totalorder %s48_s12, %s1410_s14  ;;  %p1416_p12 = scmp.lt.s32.totalorder %s1410_s14, %s1410_s14 }
  0x1f   :  { %p1417_p13 = por %p1416_p12, %p1415_p11 }
  0x21   :  { %p1418_p0 = pnand %p1417_p13, %p1411_p10 }
  0x23   :  { %1421 = shalt.err (!%p1418_p0)
}
  0x24   :  { %53 = dma.hbm_to_vmem [thread:$0]  %s1584_s4, 1024, %s48_s12, [#allocation5], %s1449_s24, %s1449_s24, %s1450_s25  }
  0x25   :  { %s1430_s2 = scalar_lea.vmem %s61_s3, 128  ;;  %p1435_p2 = scmp.lt.s32.totalorder %s61_s3, %s61_s3 }
  0x26   :  { %p1431_p1 = scmp.ne.s32.totalorder %s61_s3, %s1430_s2  ;;  %p1436_p3 = scmp.lt.s32.totalorder %s1430_s2, %s1430_s2 }
  0x28   :  { %p1437_p4 = por %p1436_p3, %p1435_p2 }
  0x2a   :  { %p1438_p5 = pnand %p1437_p4, %p1431_p1 }
  0x2c   :  { %1441 = shalt.err (!%p1438_p5)
}
  0x2d   :  { %63 = dma.hbm_to_vmem [thread:$0]  %s1585_s5, 128, %s61_s3, [#allocation8]  }
  0x2e   :  { %1442 = dma.done.wait [#allocation3], 8192  }
  0x2f   :  { %1443 = vsyncadd [#allocation3], 4294959104 }
  0x30   :  { %1444 = dma.done.wait [#allocation5], 3072  }
  0x31   :  { %1445 = vsyncadd [#allocation5], 4294964224 }
  0x32   :  { %1446 = dma.done.wait [#allocation8], 128  }
  0x33   :  { %1447 = vsyncadd [#allocation8], 4294967168  ;;  %v1456_v0 = vmov 0   ;;  %v1226_v1 = vld [vmem:[%s1581_s1 + $0x24] ss:$16 sps:$4 sm:$0xff]   ;;  %vm150_vm0 = vcmask 261120  }
  0x34   :  { %186 = vmatprep.mubr.bf16.mxu0 %v1456_v0  ;;  %227 = vmatprep.mubr.bf16.mxu1 %v1456_v0  ;;  %v1228_v2 = vld [vmem:[%s1581_s1 + $0x2c] ss:$16 sps:$4 sm:$0xff]   ;;  %v1230_v3 = vld [vmem:[%s1581_s1 + $0x20] ss:$16 sps:$4 sm:$0xff]   ;;  %v1231_v4 = vld [vmem:[%s1581_s1 + $0x28] ss:$16 sps:$4 sm:$0xff]  }
  0x35   :  { %166 = vmatprep.subr.bf16.mxu0 %v1226_v1  ;;  %207 = vmatprep.subr.bf16.mxu1 %v1228_v2  ;;  %v1232_v5 = vld [vmem:[%s1581_s1 + $0x4] ss:$16 sps:$4 sm:$0xff]   ;;  %v1234_v6 = vld [vmem:[%s1581_s1 + $0xc] ss:$16 sps:$4 sm:$0xff]   ;;  %v1236_v7 = vld [vmem:[%s1581_s1] ss:$16 sps:$4 sm:$0xff]  }
  0x36   :  { %167 = vmatpush1.bf16.msra.mxu0 %v1230_v3  ;;  %208 = vmatpush1.bf16.msra.mxu1 %v1231_v4  ;;  %v1237_v8 = vld [vmem:[%s1581_s1 + $0x8] ss:$16 sps:$4 sm:$0xff]   ;;  %v77_v9 = vld [vmem:[%s1580_s0] sm:$0x1]  ;;  %v1240_v11 = vld [vmem:[#allocation2 + $0x74] ss:$8 sps:$4 sm:$0xff]  }
  0x37   :  { %168 = vmatprep.subr.bf16.mxu0 %v1232_v5  ;;  %209 = vmatprep.subr.bf16.mxu1 %v1234_v6  ;;  %v1238_v10 = vld [vmem:[#allocation2 + $0x70] ss:$8 sps:$4 sm:$0xff]   ;;  %v78_v12 = vpack.c.bf16 %v77_v9, %v77_v9  ;;  %v1243_v14 = vld [vmem:[#allocation2 + $0x174] ss:$8 sps:$4 sm:$0xff]   ;;  %v1246_v15 = vld [vmem:[#allocation2 + $0x64] ss:$8 sps:$4 sm:$0xff]  }
  0x38   :  { %v1241_v13 = vld [vmem:[#allocation2 + $0x170] ss:$8 sps:$4 sm:$0xff]   ;;  %v1249_v16 = vld [vmem:[#allocation2 + $0x164] ss:$8 sps:$4 sm:$0xff]   ;;  %v1244_v17 = vld [vmem:[#allocation2 + $0x60] ss:$8 sps:$4 sm:$0xff]  }
  0x39   :  { %v1247_v18 = vld [vmem:[#allocation2 + $0x160] ss:$8 sps:$4 sm:$0xff]   ;;  %v1252_v19 = vld [vmem:[#allocation2 + $0x54] ss:$8 sps:$4 sm:$0xff]   ;;  %v1250_v21 = vld [vmem:[#allocation2 + $0x50] ss:$8 sps:$4 sm:$0xff]  }
  0x3a   :  { %169 = vmatpush1.bf16.msra.mxu0 %v1236_v7  ;;  %210 = vmatpush1.bf16.msra.mxu1 %v1237_v8  ;;  %v1255_v20 = vld [vmem:[#allocation2 + $0x154] ss:$8 sps:$4 sm:$0xff]   ;;  %v1253_v22 = vld [vmem:[#allocation2 + $0x150] ss:$8 sps:$4 sm:$0xff]   ;;  %v1258_v23 = vld [vmem:[#allocation2 + $0x44] ss:$8 sps:$4 sm:$0xff]  }
  0x3b   :  { %640 = vmatprep.subr.bf16.mxu0 %v1240_v11  ;;  %681 = vmatprep.subr.bf16.mxu1 %v1243_v14  ;;  %v1261_v24 = vld [vmem:[#allocation2 + $0x144] ss:$8 sps:$4 sm:$0xff]   ;;  %v1256_v25 = vld [vmem:[#allocation2 + $0x40] ss:$8 sps:$4 sm:$0xff]   ;;  %v1264_v27 = vld [vmem:[#allocation2 + $0x34] ss:$8 sps:$4 sm:$0xff]  }
  0x3c   :  { %v1259_v26 = vld [vmem:[#allocation2 + $0x140] ss:$8 sps:$4 sm:$0xff]   ;;  %v1267_v28 = vld [vmem:[#allocation2 + $0x134] ss:$8 sps:$4 sm:$0xff]   ;;  %v1262_v29 = vld [vmem:[#allocation2 + $0x30] ss:$8 sps:$4 sm:$0xff]  }
  0x3d   :  { %1074 = vmatmul.mubr.msk.bf16.vlgmr.msra.gmra.mxu0 %vm150_vm0, %v78_v12  ;;  %1075 = vmatmul.mubr.msk.bf16.vlgmr.msra.gmra.mxu1 %vm150_vm0, %v78_v12  ;;  %v1265_v30 = vld [vmem:[#allocation2 + $0x130] ss:$8 sps:$4 sm:$0xff]   ;;  %v1270_v31 = vld [vmem:[#allocation2 + $0x24] ss:$8 sps:$4 sm:$0xff]   ;;  %v1268_v33 = vld [vmem:[#allocation2 + $0x20] ss:$8 sps:$4 sm:$0xff]   ;;  %v130_v12 = vlaneseq }
  0x3e   :  { %641 = vmatpush1.bf16.msra.mxu0 %v1238_v10  ;;  %682 = vmatpush1.bf16.msra.mxu1 %v1241_v13  ;;  %v1273_v32 = vld [vmem:[#allocation2 + $0x124] ss:$8 sps:$4 sm:$0xff]   ;;  %v1271_v34 = vld [vmem:[#allocation2 + $0x120] ss:$8 sps:$4 sm:$0xff]   ;;  %v1276_v35 = vld [vmem:[#allocation2 + $0x14] ss:$8 sps:$4 sm:$0xff]  }
  0x3f   :  { %642 = vmatprep.subr.bf16.mxu0 %v1246_v15  ;;  %683 = vmatprep.subr.bf16.mxu1 %v1249_v16  ;;  %v1279_v36 = vld [vmem:[#allocation2 + $0x114] ss:$8 sps:$4 sm:$0xff]   ;;  %v1274_v37 = vld [vmem:[#allocation2 + $0x10] ss:$8 sps:$4 sm:$0xff]   ;;  %v1282_v39 = vld [vmem:[#allocation2 + $0x4] ss:$8 sps:$4 sm:$0xff]  }
  0x40   :  { %v1277_v38 = vld [vmem:[#allocation2 + $0x110] ss:$8 sps:$4 sm:$0xff]   ;;  %v1285_v40 = vld [vmem:[#allocation2 + $0x104] ss:$8 sps:$4 sm:$0xff]   ;;  %v1280_v41 = vld [vmem:[#allocation2] ss:$8 sps:$4 sm:$0xff]  }
  0x41   :  { %v1283_v42 = vld [vmem:[#allocation2 + $0x100] ss:$8 sps:$4 sm:$0xff]   ;;  %v1288_v43 = vld [vmem:[#allocation2 + $0xf4] ss:$8 sps:$4 sm:$0xff]   ;;  %v1286_v45 = vld [vmem:[#allocation2 + $0xf0] ss:$8 sps:$4 sm:$0xff]  }
  0x42   :  { %643 = vmatpush1.bf16.msra.mxu0 %v1244_v17  ;;  %684 = vmatpush1.bf16.msra.mxu1 %v1247_v18  ;;  %v1291_v44 = vld [vmem:[#allocation2 + $0x1f4] ss:$8 sps:$4 sm:$0xff]   ;;  %v1289_v46 = vld [vmem:[#allocation2 + $0x1f0] ss:$8 sps:$4 sm:$0xff]   ;;  %v1294_v47 = vld [vmem:[#allocation2 + $0xe4] ss:$8 sps:$4 sm:$0xff]  }
  0x43   :  { %644 = vmatprep.subr.bf16.mxu0 %v1252_v19  ;;  %685 = vmatprep.subr.bf16.mxu1 %v1255_v20  ;;  %v1297_v48 = vld [vmem:[#allocation2 + $0x1e4] ss:$8 sps:$4 sm:$0xff]   ;;  %v1292_v49 = vld [vmem:[#allocation2 + $0xe0] ss:$8 sps:$4 sm:$0xff]   ;;  %v1300_v51 = vld [vmem:[#allocation2 + $0xd4] ss:$8 sps:$4 sm:$0xff]  }
  0x44   :  { %v1295_v50 = vld [vmem:[#allocation2 + $0x1e0] ss:$8 sps:$4 sm:$0xff]   ;;  %v1303_v52 = vld [vmem:[#allocation2 + $0x1d4] ss:$8 sps:$4 sm:$0xff]   ;;  %v1298_v53 = vld [vmem:[#allocation2 + $0xd0] ss:$8 sps:$4 sm:$0xff]  }
  0x45   :  { %v1301_v54 = vld [vmem:[#allocation2 + $0x1d0] ss:$8 sps:$4 sm:$0xff]   ;;  %v1306_v55 = vld [vmem:[#allocation2 + $0xc4] ss:$8 sps:$4 sm:$0xff]   ;;  %v1304_v57 = vld [vmem:[#allocation2 + $0xc0] ss:$8 sps:$4 sm:$0xff]  }
  0x46   :  { %645 = vmatpush1.bf16.msra.mxu0 %v1250_v21  ;;  %686 = vmatpush1.bf16.msra.mxu1 %v1253_v22  ;;  %v1309_v56 = vld [vmem:[#allocation2 + $0x1c4] ss:$8 sps:$4 sm:$0xff]   ;;  %v1307_v58 = vld [vmem:[#allocation2 + $0x1c0] ss:$8 sps:$4 sm:$0xff]   ;;  %v1312_v59 = vld [vmem:[#allocation2 + $0xb4] ss:$8 sps:$4 sm:$0xff]  }
  0x47   :  { %646 = vmatprep.subr.bf16.mxu0 %v1258_v23  ;;  %687 = vmatprep.subr.bf16.mxu1 %v1261_v24  ;;  %v1315_v60 = vld [vmem:[#allocation2 + $0x1b4] ss:$8 sps:$4 sm:$0xff]   ;;  %v1310_v61 = vld [vmem:[#allocation2 + $0xb0] ss:$8 sps:$4 sm:$0xff]   ;;  %v1318_v63 = vld [vmem:[#allocation2 + $0xa4] ss:$8 sps:$4 sm:$0xff]  }
  0x48   :  { %v1313_v62 = vld [vmem:[#allocation2 + $0x1b0] ss:$8 sps:$4 sm:$0xff]   ;;  %v1321_v0 = vld [vmem:[#allocation2 + $0x1a4] ss:$8 sps:$4 sm:$0xff]   ;;  %v1316_v1 = vld [vmem:[#allocation2 + $0xa0] ss:$8 sps:$4 sm:$0xff]  }
  0x49   :  { %v1319_v2 = vld [vmem:[#allocation2 + $0x1a0] ss:$8 sps:$4 sm:$0xff]   ;;  %v1324_v3 = vld [vmem:[#allocation2 + $0x94] ss:$8 sps:$4 sm:$0xff]   ;;  %v1322_v5 = vld [vmem:[#allocation2 + $0x90] ss:$8 sps:$4 sm:$0xff]  }
  0x4a   :  { %647 = vmatpush1.bf16.msra.mxu0 %v1256_v25  ;;  %688 = vmatpush1.bf16.msra.mxu1 %v1259_v26  ;;  %v1327_v4 = vld [vmem:[#allocation2 + $0x194] ss:$8 sps:$4 sm:$0xff]   ;;  %v1325_v6 = vld [vmem:[#allocation2 + $0x190] ss:$8 sps:$4 sm:$0xff]   ;;  %v1330_v7 = vld [vmem:[#allocation2 + $0x84] ss:$8 sps:$4 sm:$0xff]  }
  0x4b   :  { %648 = vmatprep.subr.bf16.mxu0 %v1264_v27  ;;  %689 = vmatprep.subr.bf16.mxu1 %v1267_v28  ;;  %v1333_v8 = vld [vmem:[#allocation2 + $0x184] ss:$8 sps:$4 sm:$0xff]   ;;  %v1328_v9 = vld [vmem:[#allocation2 + $0x80] ss:$8 sps:$4 sm:$0xff]   ;;  %v1334_v11 = vld [vmem:[#allocation4 + $0x78] sm:$0xff]   ;;  %v1540_v13 = vshrl.u32 %v130_v12, 7 }
  0x4c   :  { %v1331_v10 = vld [vmem:[#allocation2 + $0x180] ss:$8 sps:$4 sm:$0xff]   ;;  %vm1458_vm1 = vmmov 0   ;;  %vm1006_vm3 = vcmask 1040384  }
  0x4d   :  { %v132_v14 = vsub.s32 0, %v1540_v13  ;;  %v140_v15 = vsub.s32 2, %v1540_v13  ;;  %v88_v16 = vld [vmem:[#allocation7] sm:$0xf]  ;;  %v136_v17 = vsub.s32 1, %v1540_v13  ;;  %v144_v18 = vsub.s32 3, %v1540_v13 }
  0x4e   :  { %649 = vmatpush1.bf16.msra.mxu0 %v1262_v29  ;;  %690 = vmatpush1.bf16.msra.mxu1 %v1265_v30  ;;  %v1355_v13 = vld [vmem:[#allocation6 + $0x10] sm:$0xff]  }
  0x4f   :  { %650 = vmatprep.subr.bf16.mxu0 %v1270_v31  ;;  %691 = vmatprep.subr.bf16.mxu1 %v1273_v32  ;;  %v133_v19 = vrot.slane %v88_v16, %v132_v14  ;;  %v141_v20 = vrot.slane %v88_v16, %v140_v15  ;;  %v137_v21 = vrot.slane %v88_v16, %v136_v17 }
  0x50   :  { %v145_v22 = vrot.slane %v88_v16, %v144_v18 }
  0x52   :  { %651 = vmatpush1.bf16.msra.mxu0 %v1268_v33  ;;  %692 = vmatpush1.bf16.msra.mxu1 %v1271_v34 }
  0x53   :  { %652 = vmatprep.subr.bf16.mxu0 %v1276_v35  ;;  %693 = vmatprep.subr.bf16.mxu1 %v1279_v36 }
  0x56   :  { %653 = vmatpush1.bf16.msra.mxu0 %v1274_v37  ;;  %694 = vmatpush1.bf16.msra.mxu1 %v1277_v38 }
  0x57   :  { %654 = vmatprep.subr.bf16.mxu0 %v1282_v39  ;;  %695 = vmatprep.subr.bf16.mxu1 %v1285_v40 }
  0x5a   :  { %655 = vmatpush1.bf16.msra.mxu0 %v1280_v41  ;;  %696 = vmatpush1.bf16.msra.mxu1 %v1283_v42  ;;  %v1335_v42 = vld [vmem:[#allocation4 + $0x38] sm:$0xff]  }
  0x5b   :  { %656 = vmatprep.subr.bf16.mxu0 %v1288_v43  ;;  %697 = vmatprep.subr.bf16.mxu1 %v1291_v44  ;;  %v1336_v44 = vld [vmem:[#allocation4 + $0x70] sm:$0xff]  }
  0x5e   :  { %657 = vmatpush2.bf16.msra.mxu0 %v1286_v45  ;;  %698 = vmatpush2.bf16.msra.mxu1 %v1289_v46  ;;  %v1337_v45 = vld [vmem:[#allocation4 + $0x30] sm:$0xff]   ;;  %v1338_v46 = vld [vmem:[#allocation4 + $0x68] sm:$0xff]  }
  0x5f   :  { %658 = vmatprep.subr.bf16.mxu0 %v1294_v47  ;;  %699 = vmatprep.subr.bf16.mxu1 %v1297_v48  ;;  %v1339_v47 = vld [vmem:[#allocation4 + $0x28] sm:$0xff]   ;;  %v1340_v48 = vld [vmem:[#allocation4 + $0x60] sm:$0xff]  }
  0x62   :  { %659 = vmatpush2.bf16.msra.mxu0 %v1292_v49  ;;  %700 = vmatpush2.bf16.msra.mxu1 %v1295_v50  ;;  %v1341_v49 = vld [vmem:[#allocation4 + $0x20] sm:$0xff]   ;;  %v1342_v50 = vld [vmem:[#allocation4 + $0x58] sm:$0xff]  }
  0x63   :  { %660 = vmatprep.subr.bf16.mxu0 %v1300_v51  ;;  %701 = vmatprep.subr.bf16.mxu1 %v1303_v52  ;;  %v1343_v51 = vld [vmem:[#allocation4 + $0x18] sm:$0xff]   ;;  %v1344_v52 = vld [vmem:[#allocation4 + $0x50] sm:$0xff]  }
  0x66   :  { %661 = vmatpush2.bf16.msra.mxu0 %v1298_v53  ;;  %702 = vmatpush2.bf16.msra.mxu1 %v1301_v54  ;;  %v1345_v53 = vld [vmem:[#allocation4 + $0x10] sm:$0xff]   ;;  %v1346_v54 = vld [vmem:[#allocation4 + $0x48] sm:$0xff]  }
  0x67   :  { %662 = vmatprep.subr.bf16.mxu0 %v1306_v55  ;;  %703 = vmatprep.subr.bf16.mxu1 %v1309_v56  ;;  %v1347_v55 = vld [vmem:[#allocation4 + $0x8] sm:$0xff]   ;;  %v1348_v56 = vld [vmem:[#allocation4 + $0x40] sm:$0xff]  }
  0x6a   :  { %663 = vmatpush2.bf16.msra.mxu0 %v1304_v57  ;;  %704 = vmatpush2.bf16.msra.mxu1 %v1307_v58  ;;  %v1349_v57 = vld [vmem:[#allocation4] sm:$0xff]   ;;  %v1350_v58 = vld [vmem:[#allocation6 + $0x38] sm:$0xff]  }
  0x6b   :  { %664 = vmatprep.subr.bf16.mxu0 %v1312_v59  ;;  %705 = vmatprep.subr.bf16.mxu1 %v1315_v60  ;;  %v1457_v59 = vmov 0.0   ;;  %v1351_v60 = vld [vmem:[#allocation6 + $0x30] sm:$0xff]  }
  0x6e   :  { %665 = vmatpush2.bf16.msra.mxu0 %v1310_v61  ;;  %706 = vmatpush2.bf16.msra.mxu1 %v1313_v62  ;;  %v1352_v61 = vld [vmem:[#allocation6 + $0x28] sm:$0xff]   ;;  %v1353_v62 = vld [vmem:[#allocation6 + $0x20] sm:$0xff]  }
  0x6f   :  { %666 = vmatprep.subr.bf16.mxu0 %v1318_v63  ;;  %707 = vmatprep.subr.bf16.mxu1 %v1321_v0  ;;  %v1354_v63 = vld [vmem:[#allocation6 + $0x18] sm:$0xff]   ;;  %v308_v0 = vld [vmem:[#allocation7 + $0x4] sm:$0x3] }
  0x72   :  { %667 = vmatpush2.bf16.msra.mxu0 %v1316_v1  ;;  %708 = vmatpush2.bf16.msra.mxu1 %v1319_v2  ;;  %v633_v1 = vrot.slane %v308_v0, %v132_v14  ;;  %v637_v2 = vrot.slane %v308_v0, %v136_v17  ;;  %v1356_v14 = vld [vmem:[#allocation6 + $0x8] sm:$0xff]   ;;  %v1357_v17 = vld [vmem:[#allocation6] sm:$0xff]  }
  0x73   :  { %668 = vmatprep.subr.bf16.mxu0 %v1324_v3  ;;  %709 = vmatprep.subr.bf16.mxu1 %v1327_v4 }
  0x76   :  { %669 = vmatpush2.bf16.msra.mxu0 %v1322_v5  ;;  %710 = vmatpush2.bf16.msra.mxu1 %v1325_v6 }
  0x77   :  { %670 = vmatprep.subr.bf16.mxu0 %v1330_v7  ;;  %711 = vmatprep.subr.bf16.mxu1 %v1333_v8 }
  0x7a   :  { %671 = vmatpush2.bf16.msra.mxu0 %v1328_v9  ;;  %712 = vmatpush2.bf16.msra.mxu1 %v1331_v10 }
  0x7b   :  { %1164 = vmatprep.subr.bf16.mxu0 %v1334_v11  ;;  %1195 = vmatprep.subr.bf16.mxu1 %v1457_v59 }
  0xfd   :  { %v188_v23 = vpop.f32.mrf.mxu0  ;;  %v229_v24 = vpop.f32.mrf.mxu1 }
  0xfe   :  { %v189_v25 = vadd.f32 %v188_v23, %v133_v19  ;;  %v230_v26 = vadd.f32 %v229_v24, %v141_v20  ;;  %v758_v24 = vld [vmem:[#allocation7 + $0x6] sm:$0x1] }
  0xff   :  { %v190_v27 = vpop.f32.mrf.mxu0  ;;  %v231_v28 = vpop.f32.mrf.mxu1 }
 0x100   :  { %v238_v29 = vmax.f32 %v230_v26, 0.0  ;;  %v191_v30 = vadd.f32 %v190_v27, %v137_v21  ;;  %v232_v31 = vadd.f32 %v231_v28, %v145_v22  ;;  %v236_v32 = vmax.f32 %v189_v25, 0.0 }
 0x101   :  { %v192_v33 = vpop.f32.mrf.mxu0  ;;  %v233_v34 = vpop.f32.mrf.mxu1 }
 0x102   :  { %v237_v35 = vmax.f32 %v191_v30, 0.0  ;;  %v239_v36 = vmax.f32 %v232_v31, 0.0  ;;  %v242_v37 = vpack.c.bf16 %v238_v29, %v238_v29  ;;  %v240_v43 = vpack.c.bf16 %v236_v32, %v236_v32  ;;  %v913_v33 = vld [vmem:[#allocation7 + $0x7] sm:$0x1] }
 0x103   :  { %v193_v38 = vpop.f32.mrf.mxu0  ;;  %v234_v39 = vpop.f32.mrf.mxu1  ;;  %v1555_v32 = vand.u32 127, %v130_v12 }
 0x104   :  { %v241_v40 = vpack.c.bf16 %v237_v35, %v237_v35  ;;  %v243_v41 = vpack.c.bf16 %v239_v36, %v239_v36 }
 0x105   :  { %vm1004_vm2 = vcmp.lt.s32.totalorder %v1555_v32, 5  ;;  %vm1048_vm7 = vcmp.eq.s32.totalorder %v1555_v32, 5  ;;  %vm1051_vm8 = vcmp.eq.s32.totalorder %v1555_v32, 6  ;;  %vm1054_vm9 = vcmp.eq.s32.totalorder %v1555_v32, 7 }
 0x106   :  { %672 = vmatprep.mubr.bf16.mxu0 %v241_v40  ;;  %713 = vmatprep.mubr.bf16.mxu1 %v243_v41 }
 0x107   :  { %673 = vmatmul.mubr.bf16.vlgmr.msra.gmra.mxu0 %v240_v43  ;;  %714 = vmatmul.mubr.bf16.vlgmr.msra.gmra.mxu1 %v242_v37 }
 0x108   :  { %1165 = vmatpush3.bf16.msra.mxu0 %v1335_v42  ;;  %1196 = vmatpush3.bf16.msra.mxu1 %v1350_v58 }
 0x109   :  { %1166 = vmatprep.subr.bf16.mxu0 %v1336_v44  ;;  %1197 = vmatprep.subr.bf16.mxu1 %v1457_v59 }
 0x10a   :  { %1211 = vmatprep.mubr.msk.bf16.mxu1 %vm1458_vm1, %v1457_v59 }
 0x10c   :  { %1167 = vmatpush3.bf16.msra.mxu0 %v1337_v45  ;;  %1198 = vmatpush3.bf16.msra.mxu1 %v1351_v60 }
 0x10d   :  { %1168 = vmatprep.subr.bf16.mxu0 %v1338_v46  ;;  %1199 = vmatprep.subr.bf16.mxu1 %v1457_v59 }
 0x110   :  { %1169 = vmatpush3.bf16.msra.mxu0 %v1339_v47  ;;  %1200 = vmatpush3.bf16.msra.mxu1 %v1352_v61 }
 0x111   :  { %1170 = vmatprep.subr.bf16.mxu0 %v1340_v48  ;;  %1201 = vmatprep.subr.bf16.mxu1 %v1457_v59 }
 0x114   :  { %1171 = vmatpush3.bf16.msra.mxu0 %v1341_v49  ;;  %1202 = vmatpush3.bf16.msra.mxu1 %v1353_v62  ;;  %v79_v49 = vld [vmem:[%s1580_s0 + $0x1] sm:$0x1] }
 0x115   :  { %1172 = vmatprep.subr.bf16.mxu0 %v1342_v50  ;;  %1203 = vmatprep.subr.bf16.mxu1 %v1457_v59 }
 0x118   :  { %1173 = vmatpush3.bf16.msra.mxu0 %v1343_v51  ;;  %1204 = vmatpush3.bf16.msra.mxu1 %v1354_v63 }
 0x119   :  { %1174 = vmatprep.subr.bf16.mxu0 %v1344_v52  ;;  %1205 = vmatprep.subr.bf16.mxu1 %v1457_v59 }
 0x11c   :  { %1175 = vmatpush3.bf16.msra.mxu0 %v1345_v53  ;;  %1206 = vmatpush3.bf16.msra.mxu1 %v1355_v13 }
 0x11d   :  { %1176 = vmatprep.subr.bf16.mxu0 %v1346_v54  ;;  %1207 = vmatprep.subr.bf16.mxu1 %v1457_v59 }
 0x120   :  { %1177 = vmatpush3.bf16.msra.mxu0 %v1347_v55  ;;  %1208 = vmatpush3.bf16.msra.mxu1 %v1356_v14 }
 0x121   :  { %1178 = vmatprep.subr.bf16.mxu0 %v1348_v56  ;;  %1209 = vmatprep.subr.bf16.mxu1 %v1457_v59 }
 0x124   :  { %1179 = vmatpush3.bf16.msra.mxu0 %v1349_v57  ;;  %1210 = vmatpush3.bf16.msra.mxu1 %v1357_v17 }
 0x1c7   :  { %v674_v3 = vpop.f32.mrf.mxu0  ;;  %v715_v4 = vpop.f32.mrf.mxu1 }
 0x1c8   :  { %v675_v5 = vadd.f32 %v674_v3, %v633_v1 }
 0x1c9   :  { %v676_v6 = vpop.f32.mrf.mxu0  ;;  %v717_v7 = vpop.f32.mrf.mxu1 }
 0x1ca   :  { %v716_v8 = vadd.f32 %v715_v4, %v675_v5  ;;  %v677_v9 = vadd.f32 %v676_v6, %v637_v2 }
 0x1cb   :  { %v678_v10 = vpop.f32.mrf.mxu0  ;;  %v719_v11 = vpop.f32.mrf.mxu1 }
 0x1cc   :  { %v718_v15 = vadd.f32 %v717_v7, %v677_v9  ;;  %v722_v16 = vmax.f32 %v716_v8, 0.0 }
 0x1cd   :  { %v679_v18 = vpop.f32.mrf.mxu0  ;;  %v720_v19 = vpop.f32.mrf.mxu1 }
 0x1ce   :  { %v723_v20 = vmax.f32 %v718_v15, 0.0  ;;  %v724_v22 = vpack.c.bf16 %v722_v16, %v722_v16 }
 0x1d0   :  { %v725_v21 = vpack.c.bf16 %v723_v20, %v723_v20 }
 0x1d2   :  { %887 = vmatprep.mubr.bf16.mxu0 %v725_v21 }
 0x1d3   :  { %888 = vmatmul.mubr.bf16.vlgmr.msra.gmra.mxu0 %v724_v22 }
 0x293   :  { %v1180_v23 = vpop.f32.mrf.mxu0 }
 0x295   :  { %v1181_v25 = vpop.f32.mrf.mxu0 }
 0x296   :  { %v1182_v26 = vadd.f32 %v1181_v25, %v1180_v23 }
 0x297   :  { %v1183_v27 = vpop.f32.mrf.mxu0 }
 0x298   :  { %v890_v28 = vadd.f32 %v1182_v26, %v758_v24 }
 0x299   :  { %v1184_v29 = vpop.f32.mrf.mxu0 }
 0x29a   :  { %v895_v30 = vmax.f32 %v890_v28, 0.0 }
 0x29c   :  { %v896_v31 = vpack.c.bf16 %v895_v30, %v895_v30 }
 0x29e   :  { %1212 = vmatmul.mubr.bf16.vlgmr.msra.gmra.mxu1 %v896_v31 }
 0x35e   :  { %v996_v34 = vpop.f32.mrf.mxu1 }
 0x35f   :  { %v997_v35 = vadd.f32 %v996_v34, %v913_v33 }
 0x360   :  { %v1213_v36 = vpop.f32.mrf.mxu1 }
 0x361   :  { %v1005_v37 = vsel %vm1004_vm2, %v997_v35, -1e+30  ;;  %v1049_v8 = vsel %vm1048_vm7, %v997_v35, 0.0 }
 0x362   :  { %v999_v38 = vpop.f32.mrf.mxu1  ;;  %v1007_v39 = vsel %vm1006_vm3, %v1005_v37, -inf }
 0x363   :  { %1008 = vmax.xlane.f32.xlu0 %v1007_v39 }
 0x364   :  { %v1214_v40 = vpop.f32.mrf.mxu1 }
 0x3ec   :  { %v1009_v41 = vpop.xlane.xlu0 %1008 }
 0x3ed   :  { %v1010_v42 = vsub.f32 %v1005_v37, %v1009_v41 }
 0x3ef   :  { %v1011_v43 = vmul.f32 1.442695, %v1010_v42 }
 0x3f1   :  { %1358 = vpow2.f32 %v1011_v43 }
 0x3fe   :  { %v1359_v12 = vpop.eup %1358 }
 0x3ff   :  { %v1013_v44 = vsel %vm1006_vm3, %v1359_v12, 0.0 }
 0x400   :  { %1014 = vadd.xlane.f32.xlu0 %v1013_v44 }
 0x489   :  { %v1015_v45 = vpop.xlane.xlu0 %1014 }
 0x48a   :  { %1360 = vlog2.f32 %v1015_v45 }
 0x497   :  { %v1361_v46 = vpop.eup %1360 }
 0x498   :  { %v1017_v47 = vmul.f32 0.6931472, %v1361_v46 }
 0x49a   :  { %v1018_v48 = vadd.f32 %v1017_v47, %v1009_v41 }
 0x49c   :  { %v1019_v50 = vsub.f32 %v997_v35, %v1018_v48 }
 0x49e   :  { %v1020_v51 = vadd.f32 %v1019_v50, %v79_v49  ;;  %v1047_v6 = vsel %vm1004_vm2, %v1019_v50, 0.0 }
 0x49f   :  { %v1050_v9 = vadd.f32 %v1049_v8, %v1047_v6 }
 0x4a0   :  { %v1021_v52 = vsel %vm1004_vm2, %v1020_v51, -1e+30 }
 0x4a1   :  { %v1022_v53 = vsel %vm1006_vm3, %v1021_v52, -inf }
 0x4a2   :  { %1023 = vmax.xlane.f32.xlu1 %v1022_v53 }
 0x52b   :  { %v1024_v54 = vpop.xlane.xlu1 %1023 }
 0x52c   :  { %vm1025_vm4 = vcmp.ge.f32.partialorder %v1021_v52, %v1024_v54 }
 0x52d   :  { %v1026_v55 = vsel %vm1025_vm4, %v1555_v32, 128 }
 0x52e   :  { %v1027_v56 = vsel %vm1006_vm3, %v1026_v55, 2147483647 }
 0x52f   :  { %v1029_v57 = vshra.s32 %v1027_v56, 16  ;;  %v1028_v59 = vand.u32 65535, %v1027_v56 }
 0x531   :  { %v1031_v58 = vcvt.s32.f32 %v1029_v57  ;;  %v1030_v61 = vcvt.s32.f32 %v1028_v59 }
 0x533   :  { %1032 = vmin.xlane.f32.xlu1 %v1031_v58 }
 0x5bc   :  { %v1033_v60 = vpop.xlane.xlu1 %1032 }
 0x5bd   :  { %vm1034_vm5 = vcmp.eq.f32.partialorder %v1031_v58, %v1033_v60  ;;  %v1039_v63 = vcvt.f32.s32 %v1033_v60 }
 0x5be   :  { %v1035_v62 = vsel %vm1034_vm5, %v1030_v61, inf }
 0x5bf   :  { %1036 = vmin.xlane.f32.xlu0 %v1035_v62  ;;  %v1040_v1 = vshll.u32 %v1039_v63, 16 }
 0x648   :  { %v1037_v0 = vpop.xlane.xlu0 %1036 }
 0x649   :  { %v1038_v2 = vcvt.f32.s32 %v1037_v0 }
 0x64b   :  { %v1041_v3 = vadd.s32 %v1040_v1, %v1038_v2 }
 0x64d   :  { %vm1042_vm6 = vcmp.eq.s32.totalorder %v1555_v32, %v1041_v3  ;;  %v1055_v7 = vcvt.s32.f32 %v1041_v3 }
 0x64e   :  { %v1043_v4 = vsel %vm1042_vm6, %v1019_v50, 0.0 }
 0x64f   :  { %v1044_v5 = vsel %vm1006_vm3, %v1043_v4, 0.0  ;;  %v1056_v16 = vsel %vm1054_vm9, %v1055_v7, 0.0 }
 0x650   :  { %1045 = vadd.xlane.f32.xlu1 %v1044_v5 }
 0x6d9   :  { %v1046_v10 = vpop.xlane.xlu1 %1045 }
 0x6da   :  { %v1052_v11 = vsel %vm1051_vm8, %v1046_v10, 0.0 }
 0x6db   :  { %v1053_v15 = vadd.f32 %v1052_v11, %v1050_v9 }
 0x6dd   :  { %v1057_v18 = vadd.f32 %v1056_v16, %v1053_v15 }
 0x6df   :  { %1058 = vst [vmem:[%s1586_s6] sm:$0x1] %v1057_v18 }
 0x6e0   :  { %1063 = vsyncpa [#allocation3], 1 }
 0x6e1   :  { %1064 = vsyncpa [#allocation5], 1 }
 0x6e2   :  { %1065 = vsyncpa [#allocation8], 1 }

</bundles_post_ra>
